<compile_context>
chip_gen: v5e
topology: v5e:2x2
jax: 0.10.0
libtpu: 0.0.40
codegen_flags: <defaults>
</compile_context>

<pallas_src>
import math

import numpy as np

import jax
import jax.numpy as jnp
from jax import lax
from jax.experimental import pallas as pl
from jax.experimental.pallas import tpu as pltpu


# ---------------------------------------------------------------------------
# Fully-fused network kernel (single sequence tile): all TemporalBlocks in
# one pallas_call, grid = (batch,).
# ---------------------------------------------------------------------------
def _make_fused_tcn_kernel(*, layer_meta, S, compute_dtype):
    """layer_meta: list of (K, dilation, c_in, c_out) per TemporalBlock."""

    def kernel(x_ref, *refs):
        o_ref = refs[-1]
        wrefs = refs[:-1]
        # Fold the BSF -> channel-major transpose into the kernel.
        x = x_ref[0].T.astype(jnp.float32)                 # (F, S)
        for i, (K, d, c_in, c_out) in enumerate(layer_meta):
            w1 = wrefs[3 * i][...]
            b1 = wrefs[3 * i + 1][...].astype(jnp.float32)
            w2 = wrefs[3 * i + 2][...]
            pad = (K - 1) * d
            # conv1 + bias + ReLU: fold the K dilated taps into one MXU matmul.
            if pad > 0:
                xe = jnp.concatenate(
                    [jnp.zeros((c_in, pad), jnp.float32), x], axis=-1)
            else:
                xe = x
            taps = [xe[:, k * d:k * d + S] for k in range(K)]
            st = jnp.concatenate(taps, axis=0) if K > 1 else taps[0]
            h = jnp.dot(w1, st.astype(compute_dtype),
                        preferred_element_type=jnp.float32)
            h = jnp.maximum(h + b1, 0.0)                   # (c_out, S)
            # conv2 (bias=False) + ReLU.
            if pad > 0:
                he = jnp.concatenate(
                    [jnp.zeros((c_out, pad), jnp.float32), h], axis=-1)
            else:
                he = h
            taps2 = [he[:, k * d:k * d + S] for k in range(K)]
            st2 = jnp.concatenate(taps2, axis=0) if K > 1 else taps2[0]
            y = jnp.dot(w2, st2.astype(compute_dtype),
                        preferred_element_type=jnp.float32)
            x = jnp.maximum(y, 0.0)                        # (c_out, S)
        o_ref[0] = x.T.astype(o_ref.dtype)                 # back to BSF

    return kernel


def _pack_block_weights(w1, b1, w2, compute_dtype):
    """Fold the K taps into the matmul contraction dim: (C_out, K*C_in),
    ordered so row k*C_in + c pairs with tap-k shifted channel c."""
    c_mid, c_in, K = w1.shape
    c_out, wc_mid, _ = w2.shape
    w1_2d = jnp.transpose(w1, (0, 2, 1)).reshape(c_mid, K * c_in).astype(compute_dtype)
    w2_2d = jnp.transpose(w2, (0, 2, 1)).reshape(c_out, K * wc_mid).astype(compute_dtype)
    b1_2d = b1.reshape(c_mid, 1).astype(jnp.float32)
    return w1_2d, b1_2d, w2_2d


def _tcn_fused_forward(x_bsf, params, *, compute_dtype=jnp.float32):
    """Whole-network fused forward for sequences that fit in one tile."""
    B, S, F = x_bsf.shape
    isz = np.dtype(x_bsf.dtype).itemsize
    wsz = np.dtype(compute_dtype).itemsize

    layer_meta = []
    args = [x_bsf]
    in_specs = [pl.BlockSpec((1, S, F), lambda b: (b, 0, 0))]
    flops = 0
    wbytes = 0
    c_in = F
    for p in params:
        w1, b1, w2, d = p["w1"], p["b1"], p["w2"], p["dilation"]
        c_out, wc_in, K = w1.shape
        assert wc_in == c_in
        w1_2d, b1_2d, w2_2d = _pack_block_weights(w1, b1, w2, compute_dtype)
        args += [w1_2d, b1_2d, w2_2d]
        in_specs += [
            pl.BlockSpec(w1_2d.shape, lambda b: (0, 0)),
            pl.BlockSpec(b1_2d.shape, lambda b: (0, 0)),
            pl.BlockSpec(w2_2d.shape, lambda b: (0, 0)),
        ]
        layer_meta.append((K, d, c_in, c_out))
        flops += 2 * B * S * K * (c_out * c_in + c_out * c_out)
        wbytes += (w1_2d.size + w2_2d.size) * wsz + b1_2d.size * 4
        c_in = c_out

    out_spec = pl.BlockSpec((1, S, c_in), lambda b: (b, 0, 0))
    out_shape = jax.ShapeDtypeStruct((B, S, c_in), x_bsf.dtype)

    kernel = _make_fused_tcn_kernel(
        layer_meta=layer_meta, S=S, compute_dtype=compute_dtype)

    cost = pl.CostEstimate(
        flops=flops, transcendentals=0,
        bytes_accessed=x_bsf.size * isz + B * S * c_in * isz + wbytes)

    return pl.pallas_call(
        kernel,
        out_shape=out_shape,
        grid=(B,),
        in_specs=in_specs,
        out_specs=out_spec,
        compiler_params=pltpu.CompilerParams(
            dimension_semantics=("parallel",)),
        cost_estimate=cost,
    )(*args)


# ---------------------------------------------------------------------------
# Per-block fused kernel (tiled sequence):  relu(conv2(relu(conv1(x) + b1)))
# ---------------------------------------------------------------------------
def _make_block_kernel(*, K, dilation, c_in, s_tile, use_prev, prev_w,
                       in_bsf, out_bsf, compute_dtype):
    """Fused (conv1 + bias + ReLU -> conv2 + ReLU) kernel, channel-major
    (C, s_tile) with the sequence on the lane axis.  Causal padding / halos
    handled in-kernel."""
    pad = (K - 1) * dilation          # left pad of each causal conv
    halo = 2 * pad                    # total left context the fused block needs

    def load_cur(ref):
        blk = ref[0]
        blk = blk.T if in_bsf else blk
        return blk.astype(jnp.float32)                      # (c_in, s_tile)

    def load_tail(ref):
        blk = ref[0]
        if in_bsf:
            return blk[prev_w - halo:, :].T.astype(jnp.float32)
        return blk[:, prev_w - halo:].astype(jnp.float32)    # (c_in, halo)

    def fused_convs(x_ext, w1, b1, w2, j):
        # x_ext: (c_in, s_tile + halo); column m is global time
        #        j*s_tile - halo + m (columns at global time < 0 are zero).
        h_w = s_tile + pad
        taps1 = [x_ext[:, k * dilation:k * dilation + h_w] for k in range(K)]
        st1 = jnp.concatenate(taps1, axis=0) if K > 1 else taps1[0]
        h = jnp.dot(w1, st1.astype(compute_dtype),
                    preferred_element_type=jnp.float32)
        h = jnp.maximum(h + b1, 0.0)                         # (c_mid, s_tile+pad)
        if pad > 0:
            # conv2's causal zero-pad: h at global time < 0 must be exactly 0
            # (not relu(b1)).
            t = lax.broadcasted_iota(jnp.int32, h.shape, 1) + (j * s_tile - pad)
            h = h * (t >= 0).astype(h.dtype)
        taps2 = [h[:, k * dilation:k * dilation + s_tile] for k in range(K)]
        st2 = jnp.concatenate(taps2, axis=0) if K > 1 else taps2[0]
        y = jnp.dot(w2, st2.astype(compute_dtype),
                    preferred_element_type=jnp.float32)
        return jnp.maximum(y, 0.0)                           # (c_out, s_tile)

    def store(o_ref, y):
        o_ref[0] = (y.T if out_bsf else y).astype(o_ref.dtype)

    if use_prev:
        def kernel(xc_ref, xp_ref, w1_ref, b1_ref, w2_ref, o_ref):
            j = pl.program_id(1)
            cur = load_cur(xc_ref)
            tail = load_tail(xp_ref)
            tail = tail * (j > 0).astype(tail.dtype)         # tile 0: causal zeros
            x_ext = jnp.concatenate([tail, cur], axis=-1)
            y = fused_convs(x_ext, w1_ref[...],
                            b1_ref[...].astype(jnp.float32), w2_ref[...], j)
            store(o_ref, y)
    else:
        def kernel(xc_ref, w1_ref, b1_ref, w2_ref, o_ref):
            j = pl.program_id(1)
            cur = load_cur(xc_ref)
            if halo > 0:
                x_ext = jnp.concatenate(
                    [jnp.zeros((c_in, halo), jnp.float32), cur], axis=-1)
            else:
                x_ext = cur
            y = fused_convs(x_ext, w1_ref[...],
                            b1_ref[...].astype(jnp.float32), w2_ref[...], j)
            store(o_ref, y)

    return kernel


def _choose_s_tile(S, halo, max_tile):
    """Largest lane-dense (multiple-of-128) tile that divides S, covers the
    halo and is <= max_tile; fall back to the whole sequence otherwise."""
    if S <= max_tile:
        return S
    cand = (max_tile // 128) * 128
    while cand >= 128:
        if S % cand == 0 and cand >= halo:
            return cand
        cand -= 128
    # TODO(synk): sequences with no 128-multiple divisor fall back to a single
    # (possibly large) tile; ragged last-tile support would remove this.
    return S


def temporal_block_forward(x, w1, b1, w2, dilation, *, in_bsf, out_bsf,
                           compute_dtype=jnp.float32, max_s_tile=512):
    """One TemporalBlock: relu(conv2(relu(conv1(x) + b1))), causal dilated convs.

    x is (B, S, C_in) if in_bsf else (B, C_in, S); output is (B, S, C_out) if
    out_bsf else (B, C_out, S).
    """
    if in_bsf:
        B, S, c_in = x.shape
    else:
        B, c_in, S = x.shape
    c_mid, wc_in, K = w1.shape
    c_out, wc_mid, K2 = w2.shape
    assert wc_in == c_in and wc_mid == c_mid and K2 == K

    pad = (K - 1) * dilation
    halo = 2 * pad

    s_tile = _choose_s_tile(S, halo, max_s_tile)
    num_tiles = S // s_tile
    use_prev = halo > 0 and num_tiles > 1
    # Read only the smallest 128-multiple tail of the previous tile that
    # covers the halo (keeps re-read HBM traffic tiny).
    prev_w = 0
    if use_prev:
        prev_w = 128 if (halo <= 128 and s_tile % 128 == 0) else s_tile

    w1_2d, b1_2d, w2_2d = _pack_block_weights(w1, b1, w2, compute_dtype)

    kernel = _make_block_kernel(
        K=K, dilation=dilation, c_in=c_in, s_tile=s_tile, use_prev=use_prev,
        prev_w=prev_w, in_bsf=in_bsf, out_bsf=out_bsf,
        compute_dtype=compute_dtype)

    if in_bsf:
        cur_spec = pl.BlockSpec((1, s_tile, c_in), lambda b, j: (b, j, 0))
    else:
        cur_spec = pl.BlockSpec((1, c_in, s_tile), lambda b, j: (b, 0, j))
    in_specs = [cur_spec]

    if use_prev:
        pbt = s_tile // prev_w            # prev-sized blocks per seq tile
        if in_bsf:
            prev_spec = pl.BlockSpec(
                (1, prev_w, c_in),
                lambda b, j: (b, jnp.maximum(j * pbt - 1, 0), 0))
        else:
            prev_spec = pl.BlockSpec(
                (1, c_in, prev_w),
                lambda b, j: (b, 0, jnp.maximum(j * pbt - 1, 0)))
        in_specs.append(prev_spec)

    in_specs += [
        pl.BlockSpec((c_mid, K * c_in), lambda b, j: (0, 0)),
        pl.BlockSpec((c_mid, 1), lambda b, j: (0, 0)),
        pl.BlockSpec((c_out, K * c_mid), lambda b, j: (0, 0)),
    ]

    if out_bsf:
        out_spec = pl.BlockSpec((1, s_tile, c_out), lambda b, j: (b, j, 0))
        out_shape = jax.ShapeDtypeStruct((B, S, c_out), x.dtype)
    else:
        out_spec = pl.BlockSpec((1, c_out, s_tile), lambda b, j: (b, 0, j))
        out_shape = jax.ShapeDtypeStruct((B, c_out, S), x.dtype)

    isz = np.dtype(x.dtype).itemsize
    wsz = np.dtype(compute_dtype).itemsize
    cost = pl.CostEstimate(
        flops=2 * B * S * K * (c_mid * c_in + c_out * c_mid),
        transcendentals=0,
        bytes_accessed=(x.size * isz + B * c_out * S * isz
                        + (w1_2d.size + w2_2d.size) * wsz + b1_2d.size * 4),
    )

    args = (x,) + ((x,) if use_prev else ()) + (w1_2d, b1_2d, w2_2d)
    return pl.pallas_call(
        kernel,
        out_shape=out_shape,
        grid=(B, num_tiles),
        in_specs=in_specs,
        out_specs=out_spec,
        compiler_params=pltpu.CompilerParams(
            dimension_semantics=("parallel", "parallel")),
        cost_estimate=cost,
    )(*args)


# ---------------------------------------------------------------------------
# Parameters + full network
# ---------------------------------------------------------------------------
def init_tcn_params(key, num_inputs, num_channels, kernel_size):
    """Shapes/init mirroring the PyTorch module: conv weights ~ N(0, 0.01),
    conv1 bias ~ PyTorch default uniform, conv2 has no bias."""
    params = []
    in_ch = num_inputs
    for i, out_ch in enumerate(num_channels):
        key, k1, k2, k3 = jax.random.split(key, 4)
        w1 = 0.01 * jax.random.normal(k1, (out_ch, in_ch, kernel_size), jnp.float32)
        bound = 1.0 / math.sqrt(in_ch * kernel_size)
        b1 = jax.random.uniform(k2, (out_ch,), jnp.float32, -bound, bound)
        w2 = 0.01 * jax.random.normal(k3, (out_ch, out_ch, kernel_size), jnp.float32)
        params.append(dict(w1=w1, b1=b1, w2=w2, dilation=2 ** i))
        in_ch = out_ch
    return params


def temporal_conv_net(x_bsf, params, *, compute_dtype=jnp.float32, max_s_tile=512):
    """Forward pass. x_bsf: (B, S, F). Returns (B, S, num_channels[-1])."""
    B, S, F = x_bsf.shape
    if S <= max_s_tile:
        # Whole network fused into a single pallas_call: no intermediate HBM
        # round trips, one kernel launch.
        return _tcn_fused_forward(x_bsf, params, compute_dtype=compute_dtype)

    # Long sequences: one fused pallas_call per TemporalBlock, tiled over S.
    x = x_bsf
    n = len(params)
    for i, p in enumerate(params):
        x = temporal_block_forward(
            x, p["w1"], p["b1"], p["w2"], p["dilation"],
            in_bsf=(i == 0), out_bsf=(i == n - 1),
            compute_dtype=compute_dtype, max_s_tile=max_s_tile)
        # TODO(synk): dropout omitted (identity in eval-mode forward).
    return x


# ---------------------------------------------------------------------------
# Pure-numpy (float64) reference for correctness checking
# ---------------------------------------------------------------------------
def _ref_causal_conv_np(x, w, b, d):
    B, C_in, S = x.shape
    C_out, _, K = w.shape
    pad = (K - 1) * d
    xp = np.pad(x, ((0, 0), (0, 0), (pad, 0)))
    y = np.zeros((B, C_out, S), np.float64)
    for k in range(K):
        y += np.einsum("oc,bcs->bos", w[:, :, k], xp[:, :, k * d:k * d + S])
    if b is not None:
        y += b[None, :, None]
    return y


def ref_tcn_np(x_bsf, params):
    x = np.asarray(x_bsf, np.float64).transpose(0, 2, 1)
    for p in params:
        w1 = np.asarray(p["w1"], np.float64)
        b1 = np.asarray(p["b1"], np.float64)
        w2 = np.asarray(p["w2"], np.float64)
        x = np.maximum(_ref_causal_conv_np(x, w1, b1, p["dilation"]), 0.0)
        x = np.maximum(_ref_causal_conv_np(x, w2, None, p["dilation"]), 0.0)
    return x.transpose(0, 2, 1)


if __name__ == "__main__":
    key = jax.random.PRNGKey(0)

    # Case 1: small shapes consistent with the module (fully-fused path).
    B, S, F = 2, 16, 4
    num_channels = [8, 8]
    kernel_size = 2
    key, kx, kp = jax.random.split(key, 3)
    x = jax.random.normal(kx, (B, S, F), jnp.float32)
    params = init_tcn_params(kp, F, num_channels, kernel_size)

    out = temporal_conv_net(x, params)
    jax.block_until_ready(out)
    assert out.shape == (B, S, num_channels[-1]), out.shape
    ref = ref_tcn_np(x, params)
    err = float(np.max(np.abs(np.asarray(out, np.float64) - ref)))
    assert np.allclose(np.asarray(out, np.float64), ref,
                       rtol=1e-2, atol=1e-4), err

    # Case 2: longer sequence to exercise the tiled per-block path (two
    # lane-dense 128-wide sequence tiles, halo pulled from the previous tile).
    B2, S2, F2 = 2, 256, 4
    key, kx2, kp2 = jax.random.split(key, 3)
    x2 = jax.random.normal(kx2, (B2, S2, F2), jnp.float32)
    params2 = init_tcn_params(kp2, F2, [8, 8], kernel_size)

    out2 = temporal_conv_net(x2, params2, max_s_tile=128)
    jax.block_until_ready(out2)
    assert out2.shape == (B2, S2, 8), out2.shape
    ref2 = ref_tcn_np(x2, params2)
    err2 = float(np.max(np.abs(np.asarray(out2, np.float64) - ref2)))
    assert np.allclose(np.asarray(out2, np.float64), ref2,
                       rtol=1e-2, atol=1e-4), err2

    # Case 3: fused path with K=3, three layers, mixed channel widths.
    B3, S3, F3 = 2, 64, 6
    key, kx3, kp3 = jax.random.split(key, 3)
    x3 = jax.random.normal(kx3, (B3, S3, F3), jnp.float32)
    params3 = init_tcn_params(kp3, F3, [8, 12, 16], 3)

    out3 = temporal_conv_net(x3, params3)
    jax.block_until_ready(out3)
    assert out3.shape == (B3, S3, 16), out3.shape
    ref3 = ref_tcn_np(x3, params3)
    err3 = float(np.max(np.abs(np.asarray(out3, np.float64) - ref3)))
    assert np.allclose(np.asarray(out3, np.float64), ref3,
                       rtol=1e-2, atol=1e-4), err3

    print("KERNEL_OK")
</pallas_src>

<mosaic_0001>
module attributes {stable_mosaic.version = 11 : i64} {
  func.func @kernel(%arg0: i32, %arg1: memref<1x16x4xf32, #tpu.memory_space<vmem>>, %arg2: memref<8x8xf32, #tpu.memory_space<vmem>>, %arg3: memref<8x1xf32, #tpu.memory_space<vmem>>, %arg4: memref<8x16xf32, #tpu.memory_space<vmem>>, %arg5: memref<8x16xf32, #tpu.memory_space<vmem>>, %arg6: memref<8x1xf32, #tpu.memory_space<vmem>>, %arg7: memref<8x16xf32, #tpu.memory_space<vmem>>, %arg8: memref<1x16x8xf32, #tpu.memory_space<vmem>>) attributes {dimension_semantics = [#tpu.dimension_semantics<parallel>], iteration_bounds = array<i64: 2>, scalar_prefetch = 0 : i64, scratch_operands = 0 : i64, tpu.core_type = #tpu.core_type<tc>, window_params = [{transform_indices = @transform_0, window_bounds = array<i64: 1, 16, 4>}, {pipeline_mode = #tpu.pipeline_mode<synchronous>, transform_indices = @transform_1, window_bounds = array<i64: 8, 8>}, {pipeline_mode = #tpu.pipeline_mode<synchronous>, transform_indices = @transform_2, window_bounds = array<i64: 8, 1>}, {pipeline_mode = #tpu.pipeline_mode<synchronous>, transform_indices = @transform_3, window_bounds = array<i64: 8, 16>}, {pipeline_mode = #tpu.pipeline_mode<synchronous>, transform_indices = @transform_4, window_bounds = array<i64: 8, 16>}, {pipeline_mode = #tpu.pipeline_mode<synchronous>, transform_indices = @transform_5, window_bounds = array<i64: 8, 1>}, {pipeline_mode = #tpu.pipeline_mode<synchronous>, transform_indices = @transform_6, window_bounds = array<i64: 8, 16>}, {transform_indices = @transform_7, window_bounds = array<i64: 1, 16, 8>}]} {
    %c0 = arith.constant 0 : index
    %c0_0 = arith.constant 0 : index
    %c0_1 = arith.constant 0 : index
    %0 = vector.load %arg1[%c0, %c0_0, %c0_1] : memref<1x16x4xf32, #tpu.memory_space<vmem>>, vector<1x16x4xf32>
    %1 = vector.shape_cast %0 : vector<1x16x4xf32> to vector<16x4xf32>
    %2 = tpu.transpose %1, [1, 0] : vector<16x4xf32> -> vector<4x16xf32>
    %c0_2 = arith.constant 0 : index
    %c0_3 = arith.constant 0 : index
    %3 = vector.load %arg2[%c0_2, %c0_3] : memref<8x8xf32, #tpu.memory_space<vmem>>, vector<8x8xf32>
    %c0_4 = arith.constant 0 : index
    %c0_5 = arith.constant 0 : index
    %4 = vector.load %arg3[%c0_4, %c0_5] : memref<8x1xf32, #tpu.memory_space<vmem>>, vector<8x1xf32>
    %c0_6 = arith.constant 0 : index
    %c0_7 = arith.constant 0 : index
    %5 = vector.load %arg4[%c0_6, %c0_7] : memref<8x16xf32, #tpu.memory_space<vmem>>, vector<8x16xf32>
    %cst = arith.constant 0.000000e+00 : f32
    %6 = vector.broadcast %cst : f32 to vector<4x1xf32>
    %7 = tpu.concatenate %6, %2 in 1 : vector<4x1xf32>, vector<4x16xf32> -> vector<4x17xf32>
    %8 = vector.extract_strided_slice %7 {offsets = [0, 0], sizes = [4, 16], strides = [1, 1]} : vector<4x17xf32> to vector<4x16xf32>
    %9 = vector.extract_strided_slice %7 {offsets = [0, 1], sizes = [4, 16], strides = [1, 1]} : vector<4x17xf32> to vector<4x16xf32>
    %10 = tpu.concatenate %8, %9 in 0 : vector<4x16xf32>, vector<4x16xf32> -> vector<8x16xf32>
    %cst_8 = arith.constant dense<0.000000e+00> : vector<8x16xf32>
    %11 = tpu.matmul %3, %10, %cst_8 {dimension_numbers = #tpu.dot_dimension_numbers<[1], [0], [0], [1], [0, 0, 1, 1], [], []>} : vector<8x8xf32>, vector<8x16xf32>, vector<8x16xf32> -> vector<8x16xf32>
    %12 = vector.broadcast %4 : vector<8x1xf32> to vector<8x16xf32>
    %13 = arith.addf %11, %12 : vector<8x16xf32>
    %cst_9 = arith.constant 0.000000e+00 : f32
    %14 = vector.broadcast %cst_9 : f32 to vector<8x16xf32>
    %15 = arith.maximumf %13, %14 : vector<8x16xf32>
    %cst_10 = arith.constant 0.000000e+00 : f32
    %16 = vector.broadcast %cst_10 : f32 to vector<8x1xf32>
    %17 = tpu.concatenate %16, %15 in 1 : vector<8x1xf32>, vector<8x16xf32> -> vector<8x17xf32>
    %18 = vector.extract_strided_slice %17 {offsets = [0, 0], sizes = [8, 16], strides = [1, 1]} : vector<8x17xf32> to vector<8x16xf32>
    %19 = vector.extract_strided_slice %17 {offsets = [0, 1], sizes = [8, 16], strides = [1, 1]} : vector<8x17xf32> to vector<8x16xf32>
    %20 = tpu.concatenate %18, %19 in 0 : vector<8x16xf32>, vector<8x16xf32> -> vector<16x16xf32>
    %cst_11 = arith.constant dense<0.000000e+00> : vector<8x16xf32>
    %21 = tpu.matmul %5, %20, %cst_11 {dimension_numbers = #tpu.dot_dimension_numbers<[1], [0], [0], [1], [0, 0, 1, 1], [], []>} : vector<8x16xf32>, vector<16x16xf32>, vector<8x16xf32> -> vector<8x16xf32>
    %cst_12 = arith.constant 0.000000e+00 : f32
    %22 = vector.broadcast %cst_12 : f32 to vector<8x16xf32>
    %23 = arith.maximumf %21, %22 : vector<8x16xf32>
    %c0_13 = arith.constant 0 : index
    %c0_14 = arith.constant 0 : index
    %24 = vector.load %arg5[%c0_13, %c0_14] : memref<8x16xf32, #tpu.memory_space<vmem>>, vector<8x16xf32>
    %c0_15 = arith.constant 0 : index
    %c0_16 = arith.constant 0 : index
    %25 = vector.load %arg6[%c0_15, %c0_16] : memref<8x1xf32, #tpu.memory_space<vmem>>, vector<8x1xf32>
    %c0_17 = arith.constant 0 : index
    %c0_18 = arith.constant 0 : index
    %26 = vector.load %arg7[%c0_17, %c0_18] : memref<8x16xf32, #tpu.memory_space<vmem>>, vector<8x16xf32>
    %cst_19 = arith.constant 0.000000e+00 : f32
    %27 = vector.broadcast %cst_19 : f32 to vector<8x2xf32>
    %28 = tpu.concatenate %27, %23 in 1 : vector<8x2xf32>, vector<8x16xf32> -> vector<8x18xf32>
    %29 = vector.extract_strided_slice %28 {offsets = [0, 0], sizes = [8, 16], strides = [1, 1]} : vector<8x18xf32> to vector<8x16xf32>
    %30 = vector.extract_strided_slice %28 {offsets = [0, 2], sizes = [8, 16], strides = [1, 1]} : vector<8x18xf32> to vector<8x16xf32>
    %31 = tpu.concatenate %29, %30 in 0 : vector<8x16xf32>, vector<8x16xf32> -> vector<16x16xf32>
    %cst_20 = arith.constant dense<0.000000e+00> : vector<8x16xf32>
    %32 = tpu.matmul %24, %31, %cst_20 {dimension_numbers = #tpu.dot_dimension_numbers<[1], [0], [0], [1], [0, 0, 1, 1], [], []>} : vector<8x16xf32>, vector<16x16xf32>, vector<8x16xf32> -> vector<8x16xf32>
    %33 = vector.broadcast %25 : vector<8x1xf32> to vector<8x16xf32>
    %34 = arith.addf %32, %33 : vector<8x16xf32>
    %cst_21 = arith.constant 0.000000e+00 : f32
    %35 = vector.broadcast %cst_21 : f32 to vector<8x16xf32>
    %36 = arith.maximumf %34, %35 : vector<8x16xf32>
    %cst_22 = arith.constant 0.000000e+00 : f32
    %37 = vector.broadcast %cst_22 : f32 to vector<8x2xf32>
    %38 = tpu.concatenate %37, %36 in 1 : vector<8x2xf32>, vector<8x16xf32> -> vector<8x18xf32>
    %39 = vector.extract_strided_slice %38 {offsets = [0, 0], sizes = [8, 16], strides = [1, 1]} : vector<8x18xf32> to vector<8x16xf32>
    %40 = vector.extract_strided_slice %38 {offsets = [0, 2], sizes = [8, 16], strides = [1, 1]} : vector<8x18xf32> to vector<8x16xf32>
    %41 = tpu.concatenate %39, %40 in 0 : vector<8x16xf32>, vector<8x16xf32> -> vector<16x16xf32>
    %cst_23 = arith.constant dense<0.000000e+00> : vector<8x16xf32>
    %42 = tpu.matmul %26, %41, %cst_23 {dimension_numbers = #tpu.dot_dimension_numbers<[1], [0], [0], [1], [0, 0, 1, 1], [], []>} : vector<8x16xf32>, vector<16x16xf32>, vector<8x16xf32> -> vector<8x16xf32>
    %cst_24 = arith.constant 0.000000e+00 : f32
    %43 = vector.broadcast %cst_24 : f32 to vector<8x16xf32>
    %44 = arith.maximumf %42, %43 : vector<8x16xf32>
    %45 = tpu.transpose %44, [1, 0] : vector<8x16xf32> -> vector<16x8xf32>
    %c0_25 = arith.constant 0 : index
    %c0_26 = arith.constant 0 : index
    %c0_27 = arith.constant 0 : index
    %46 = vector.load %arg8[%c0_25, %c0_26, %c0_27] : memref<1x16x8xf32, #tpu.memory_space<vmem>>, vector<1x16x8xf32>
    %47 = vector.shape_cast %46 : vector<1x16x8xf32> to vector<16x8xf32>
    %48 = vector.shape_cast %45 : vector<16x8xf32> to vector<1x16x8xf32>
    tpu.vector_store %arg8[%c0_25, %c0_26, %c0_27], %48 {strides = array<i32>} : memref<1x16x8xf32, #tpu.memory_space<vmem>>, vector<1x16x8xf32>,
    return
  }
  func.func @transform_0(%arg0: i32) -> (i32, i32, i32) {
    %c0_i32 = arith.constant 0 : i32
    %c0_i32_0 = arith.constant 0 : i32
    %c0_i32_1 = arith.constant 0 : i32
    return %arg0, %c0_i32, %c0_i32_0 : i32, i32, i32
  }
  func.func @transform_1(%arg0: i32) -> (i32, i32) {
    %c0_i32 = arith.constant 0 : i32
    %c0_i32_0 = arith.constant 0 : i32
    %c0_i32_1 = arith.constant 0 : i32
    return %c0_i32, %c0_i32_0 : i32, i32
  }
  func.func @transform_2(%arg0: i32) -> (i32, i32) {
    %c0_i32 = arith.constant 0 : i32
    %c0_i32_0 = arith.constant 0 : i32
    %c0_i32_1 = arith.constant 0 : i32
    return %c0_i32, %c0_i32_0 : i32, i32
  }
  func.func @transform_3(%arg0: i32) -> (i32, i32) {
    %c0_i32 = arith.constant 0 : i32
    %c0_i32_0 = arith.constant 0 : i32
    %c0_i32_1 = arith.constant 0 : i32
    return %c0_i32, %c0_i32_0 : i32, i32
  }
  func.func @transform_4(%arg0: i32) -> (i32, i32) {
    %c0_i32 = arith.constant 0 : i32
    %c0_i32_0 = arith.constant 0 : i32
    %c0_i32_1 = arith.constant 0 : i32
    return %c0_i32, %c0_i32_0 : i32, i32
  }
  func.func @transform_5(%arg0: i32) -> (i32, i32) {
    %c0_i32 = arith.constant 0 : i32
    %c0_i32_0 = arith.constant 0 : i32
    %c0_i32_1 = arith.constant 0 : i32
    return %c0_i32, %c0_i32_0 : i32, i32
  }
  func.func @transform_6(%arg0: i32) -> (i32, i32) {
    %c0_i32 = arith.constant 0 : i32
    %c0_i32_0 = arith.constant 0 : i32
    %c0_i32_1 = arith.constant 0 : i32
    return %c0_i32, %c0_i32_0 : i32, i32
  }
  func.func @transform_7(%arg0: i32) -> (i32, i32, i32) {
    %c0_i32 = arith.constant 0 : i32
    %c0_i32_0 = arith.constant 0 : i32
    %c0_i32_1 = arith.constant 0 : i32
    return %arg0, %c0_i32, %c0_i32_0 : i32, i32, i32
  }
}

</mosaic_0001>

<bundles_post_ra>
// kernel: tpu_custom_call.1
= control target key start
LH: loop header
LB: loop body
LE: loop exit
PB: predicated region body
PF: predicated region fallthrough
CT: control target
= control target key end

     0   :  { %s650_s24 = smov 0   ;;  %s712_s0 = inlined_call_operand.vmem [shape: f32[2,16,4], index: 0, kind: input, shape index: {}]   ;;  %s713_s1 = inlined_call_operand.vmem [shape: f32[8,8], index: 1, kind: input, shape index: {}]   ;;  %s714_s2 = inlined_call_operand.vmem [shape: f32[8,1], index: 2, kind: input, shape index: {}]   ;;  %s715_s3 = inlined_call_operand.vmem [shape: f32[8,16], index: 3, kind: input, shape index: {}]   ;;  %s716_s4 = inlined_call_operand.vmem [shape: f32[8,16], index: 4, kind: input, shape index: {}]   ;;  %s717_s5 = inlined_call_operand.vmem [shape: f32[8,1], index: 5, kind: input, shape index: {}]   ;;  %s718_s6 = inlined_call_operand.vmem [shape: f32[8,16], index: 6, kind: input, shape index: {}]   ;;  %s719_s7 = inlined_call_operand.vmem [shape: f32[2,16,8], index: 7, kind: output, shape index: {}]  }
   0x1 LB: > { %s557_s25 = sadd.s32 4294967295, %s603_s24   ;;  %p561_p0 = scmp.ge.s32.totalorder %s603_s24, 1  ;;  %s603_s24 = sphi %s650_s24, %s17_s24  }
   0x2   : > { %p237_p1 = scmp.lt.s32.totalorder %s603_s24, 3 }
   0x4   : > { %p238_p2 = pnand %p561_p0, %p237_p1 }
   0x5   : > { %p269_p3 = scmp.lt.s32.totalorder (!%p238_p2), %s557_s25, 1  ;;  %s605_s30 = smov (!%p238_p2), 1  }
   0x6   : > { %241 = sbr.rel (%p238_p2) target bundleno = 1736 (0x6c8), region = 48  ;;  %s606_s8 = smov (!%p238_p2), 127  }
   0x7   : > { %s608_s15 = smov (!%p238_p2), 2   ;;  %s609_s16 = smov (!%p238_p2), 126  }
   0xb   : > { %s723_s25 = smov (!%p269_p3, %s557_s25), 1  ;;  %vm320_vm0 = vcmask 7168   ;;  %v314_v6 = vld [vmem:[%s714_s2] sm:$0xff]  ;;  %v607_v7 = vmov 0   ;;  %vm327_vm1 = vcmask 1043456   ;;  %vm334_vm2 = vcmask 64512  }
   0xc   : > { %s578_s26 = sshll.u32 %s723_s25, 4  ;;  %594 = vset.pattern.permute.xlu2 %v607_v7  ;;  %595 = vset.pattern.permute.xlu1 %v607_v7  ;;  %v313_v9 = vld [vmem:[%s713_s1] sm:$0xff]  ;;  %vm567_vm3 = vmneg %vm320_vm0  ;;  %vm368_vm4 = vcmask 130048   ;;  %vm400_vm5 = vcmask 15360  }
   0xd   : > { %s273_s29 = scalar_lea.vmem %s712_s0, %s578_s26  ;;  %331 = vperm.xlu2 %594, %v314_v6   ;;  %v315_v18 = vld [vmem:[%s715_s3] sm:$0xff]  ;;  %vm685_vm6 = vmneg %vm400_vm5  ;;  %s278_s28 = scalar_lea.vmem %s719_s7, %s578_s26 }
   0xe   : > { %v279_v0 = vld [vmem:[%s273_s29] sm:$0xff]  ;;  %v280_v1 = vld [vmem:[%s273_s29 + $0x8] sm:$0xff] }
   0xf   : > { %281 = vxpose.xlu0.b32.start [1/2] (short) (narrow) %v279_v0, 8  ;;  %v394_v23 = vld [vmem:[%s717_s5] sm:$0xff] }
  0x10   : > { %v393_v26 = vld [vmem:[%s716_s4] sm:$0xff] }
  0x11   : > { %v395_v34 = vld [vmem:[%s718_s6] sm:$0xff] }
  0x17   : > { %282 = vxpose.xlu0.b32.end [2/2] (short) (narrow) %v280_v1, 8 }
  0x67   : > { %v332_v11 = vpop.permute.xlu2 %331 }
  0x7e   : > { %596 = vset.pattern.permute.xlu0 %v607_v7 }
  0xb3   : > { %v297_v2 = vpop.trf.xlu0 }
  0xb4   : > { %317 = vrot.lane.b32.xlu1 %v297_v2, %s605_s30 }
 0x126   : > { %v318_v3 = vpop.permute.xlu1 %317 }
 0x127   : > { %v321_v4 = vsel %vm320_vm0, 0.0, %v318_v3 }
 0x128   : > { %v323_v5 = vrot.slane %v321_v4, 4 }
 0x12a   : > { %324 = vrot.lane.b32.xlu1 %v323_v5, %s606_s8 }
 0x19c   : > { %v325_v8 = vpop.permute.xlu1 %324 }
 0x19d   : > { %v328_v10 = vsel %vm327_vm1, %v321_v4, %v325_v8 }
 0x19e   : > { %353 = vmatpush.msra.mxu0 %v328_v10 }
 0x19f   : > { %566 = vmatmul.msk.f32.vlgmr.msra.gmra.mxu0 %vm334_vm2, %v313_v9 }
 0x21c   : > { %v355_v12 = vpop.f32.mrf.mxu0 }
 0x21d   : > { %v356_v13 = vadd.f32 %v355_v12, %v332_v11 }
 0x21f   : > { %v358_v14 = vmax.f32 %v356_v13, 0.0 }
 0x221   : > { %360 = vrot.lane.b32.xlu2 %v358_v14, %s605_s30 }
 0x27b   : > { %v361_v15 = vpop.permute.xlu2 %360 }
 0x27c   : > { %v363_v16 = vsel %vm320_vm0, 0.0, %v361_v15 }
 0x27d   : > { %365 = vrot.lane.b32.xlu0 %v363_v16, %s606_s8 }
 0x2ef   : > { %v366_v17 = vpop.permute.xlu0 %365 }
 0x2f0   : > { %386 = vmatpush.msra.mxu1 %v366_v17 }
 0x2f2   : > { %568 = vmatpush.msk.msra.mxu1 %vm567_vm3, %v361_v15 }
 0x2f3   : > { %569 = vmatmul.msk.f32.vlgmr.msra.gmra.mxu1 %vm368_vm4, %v315_v18 }
 0x370   : > { %v389_v19 = vpop.f32.mrf.mxu1 }
 0x371   : > { %v392_v20 = vmax.f32 %v389_v19, 0.0 }
 0x373   : > { %397 = vrot.lane.b32.xlu1 %v392_v20, %s608_s15 }
 0x37b   : > { %408 = vperm.xlu1 %595, %v394_v23  }
 0x3e5   : > { %v398_v21 = vpop.permute.xlu1 %397 }
 0x3e6   : > { %v401_v22 = vsel %vm400_vm5, 0.0, %v398_v21 }
 0x3e7   : > { %403 = vrot.lane.b32.xlu2 %v401_v22, %s609_s16 }
 0x3ed   : > { %v409_v27 = vpop.permute.xlu1 %408 }
 0x441   : > { %v404_v24 = vpop.permute.xlu2 %403 }
 0x442   : > { %428 = vmatpush.msra.mxu2 %v404_v24 }
 0x444   : > { %571 = vmatpush.msk.msra.mxu2 %vm685_vm6, %v398_v21 }
 0x445   : > { %572 = vmatmul.msk.f32.vlgmr.msra.gmra.mxu2 %vm368_vm4, %v393_v26 }
 0x4c8   : > { %v431_v28 = vpop.f32.mrf.mxu2 }
 0x4c9   : > { %v432_v29 = vadd.f32 %v431_v28, %v409_v27 }
 0x4cb   : > { %v434_v30 = vmax.f32 %v432_v29, 0.0 }
 0x4cd   : > { %436 = vrot.lane.b32.xlu2 %v434_v30, %s608_s15 }
 0x527   : > { %v437_v31 = vpop.permute.xlu2 %436 }
 0x528   : > { %v439_v32 = vsel %vm400_vm5, 0.0, %v437_v31 }
 0x529   : > { %441 = vrot.lane.b32.xlu1 %v439_v32, %s609_s16 }
 0x59b   : > { %v442_v33 = vpop.permute.xlu1 %441 }
 0x59c   : > { %461 = vmatpush.msra.mxu3 %v442_v33 }
 0x59e   : > { %574 = vmatpush.msk.msra.mxu3 %vm685_vm6, %v437_v31 }
 0x59f   : > { %575 = vmatmul.msk.f32.vlgmr.msra.gmra.mxu3 %vm368_vm4, %v395_v34 }
 0x622   : > { %v464_v35 = vpop.f32.mrf.mxu3 }
 0x623   : > { %v467_v36 = vmax.f32 %v464_v35, 0.0 }
 0x625   : > { %468 = vxpose.xlu2.b32.start.end [1/1] (short) (narrow) %v467_v36, 16 }
 0x6be   : > { %v484_v37 = vpop.trf.xlu2 }
 0x6bf   : > { %500 = vst.msk [vmem:[%s278_s28] sm:$0xff] %vm334_vm2, %v484_v37 }
 0x6c6   : > { %v485_v38 = vpop.trf.xlu2 }
 0x6c7   : > { %501 = vst.msk [vmem:[%s278_s28 + $0x8] sm:$0xff] %vm334_vm2, %v485_v38 }
 0x6c8 PF: > { %s17_s24 = sadd.s32 1, %s603_s24  }
 0x6c9   : > { %p14_p4 = scmp.ge.s32.totalorder %s17_s24, 4  }
 0x6cb   :  { %16 = sbr.rel (!%p14_p4) target bundleno = 1 (0x1), region = 78 }

</bundles_post_ra>
